<compile_context>
chip_gen: v7x
topology: tpu7x:2x2x1
jax: 0.10.0
libtpu: 0.0.40
codegen_flags: <defaults>
</compile_context>

<pallas_src>
import jax
import jax.numpy as jnp
from jax import lax
from jax.experimental import pallas as pl
from jax.experimental.pallas import tpu as pltpu


# ---------------------------------------------------------------------------
# Pallas kernel: fused bidirectional LSTM recurrence + final projection.
# ---------------------------------------------------------------------------
def bilstm_kernel(gin_ref, whh_ref, wfc_ref, bfc_ref, out_ref, h_sc, c_sc):
    """
    gin_ref : (Tt, B, 8H) streamed chunk of precomputed gate pre-activations
              (input projection + both biases folded in; backward direction
              pre-reversed in time; layout [i_f,i_b|f_f,f_b|o_f,o_b|g_f,g_b]).
    whh_ref : (2H, 8H) block-diagonal recurrent weight (rows = [h_f | h_b]).
    wfc_ref : (2H, r_dim) FC weight, transposed (row order matches [h_f | h_b]).
    bfc_ref : (1, r_dim)
    out_ref : (B, r_dim)
    h_sc/c_sc : (B, 2H) f32 state carried across grid steps.
    """
    Tt, B, G8 = gin_ref.shape
    H2 = G8 // 4          # 2H
    H6 = 3 * H2           # 6H

    @pl.when(pl.program_id(0) == 0)
    def _init():
        h_sc[...] = jnp.zeros_like(h_sc)
        c_sc[...] = jnp.zeros_like(c_sc)

    def step(t, carry):
        h, c = carry
        # One fused matmul per timestep: (B, 2H) @ (2H, 8H).  whh_ref is
        # indexed here (not hoisted into vregs) so the vld stays schedulable
        # under the MXU and does not force spills at H >= 128.
        gates = gin_ref[t].astype(jnp.float32) + jnp.dot(
            h, whh_ref[...], preferred_element_type=jnp.float32)
        # One sigmoid over the contiguous (B, 6H) slab, one tanh over (B, 2H).
        # (jax.nn.sigmoid lowers to lax.logistic; a tanh-based rewrite would
        #  shave another EUP push if the bundle dump shows exp+recip.)
        sg = jax.nn.sigmoid(gates[:, :H6])
        g = jnp.tanh(gates[:, H6:])
        i = sg[:, :H2]
        f = sg[:, H2:2 * H2]
        o = sg[:, 2 * H2:]
        c_new = f * c + i * g
        h_new = o * jnp.tanh(c_new)
        return h_new, c_new

    # Bounded unroll: straight-line only for short chunks, window of 8 otherwise.
    unroll = True if Tt <= 16 else 8
    h, c = lax.fori_loop(0, Tt, step, (h_sc[...], c_sc[...]), unroll=unroll)
    h_sc[...] = h
    c_sc[...] = c

    @pl.when(pl.program_id(0) == pl.num_programs(0) - 1)
    def _finalize():
        # Linear(cat(h_f, h_b)): state layout already matches the cat order.
        out_ref[...] = (
            jnp.dot(h, wfc_ref[...], preferred_element_type=jnp.float32)
            + bfc_ref[...]
        )


# ---------------------------------------------------------------------------
# Wrapper
# ---------------------------------------------------------------------------
def _pick_time_chunk(T, step_bytes, budget_bytes=2 << 20):
    """Largest divisor of T whose (Tt, B, 8H) chunk fits one VMEM buffer budget."""
    max_steps = max(1, budget_bytes // max(step_bytes, 1))
    best = 1
    for d in range(1, T + 1):
        if T % d == 0 and d <= max_steps:
            best = d
    return best


def bilstm_encoder_last_op(x, y, params, *, h_dim, r_dim, gate_dtype=jnp.float32):
    """x is unused in the forward pass (matches the PyTorch module).

    gate_dtype: storage dtype of the streamed gate slabs. jnp.bfloat16 halves
    the dominant HBM->VMEM traffic at production shapes (recurrent math and
    state stay f32); keep f32 for tight-tolerance validation.
    """
    del x
    (wih_f, whh_f, bih_f, bhh_f,
     wih_b, whh_b, bih_b, bhh_b,
     w_fc, b_fc) = params

    B, T, D = y.shape
    H = h_dim
    f32 = jnp.float32
    y_tbd = jnp.transpose(y, (1, 0, 2)).astype(f32)            # (T, B, D)

    # ---- hoisted input projection: one big MXU matmul per direction ---------
    mm_dtype = jnp.bfloat16 if gate_dtype == jnp.bfloat16 else f32

    def in_proj(y_t, wih, b):
        g = jnp.einsum('tbd,gd->tbg',
                       y_t.astype(mm_dtype), wih.astype(mm_dtype),
                       preferred_element_type=f32)
        return g + b.astype(f32)

    gin_f = in_proj(y_tbd, wih_f, bih_f + bhh_f)        # (T, B, 4H) [i,f,g,o]
    gin_b = in_proj(y_tbd[::-1], wih_b, bih_b + bhh_b)  # backward, pre-reversed

    # ---- permute gates ([i,f,g,o] -> [i,f,o,g]) and interleave the two
    #      directions per gate: [i_f,i_b | f_f,f_b | o_f,o_b | g_f,g_b] ---------
    perm = jnp.array([0, 1, 3, 2], jnp.int32)
    gf = gin_f.reshape(T, B, 4, H)[:, :, perm, :]
    gb = gin_b.reshape(T, B, 4, H)[:, :, perm, :]
    gin_comb = jnp.stack([gf, gb], axis=3).reshape(T, B, 8 * H).astype(gate_dtype)

    # ---- block-diagonal recurrent weight (2H, 8H), rows = [h_f | h_b] --------
    whh_f_r = jnp.asarray(whh_f, f32).T.reshape(H, 4, H)[:, perm, :]
    whh_b_r = jnp.asarray(whh_b, f32).T.reshape(H, 4, H)[:, perm, :]
    w_comb = jnp.zeros((2 * H, 4, 2, H), f32)
    w_comb = w_comb.at[:H, :, 0, :].set(whh_f_r)
    w_comb = w_comb.at[H:, :, 1, :].set(whh_b_r)
    w_comb = w_comb.reshape(2 * H, 8 * H)

    # ---- FC weight: cat(h_f, h_b) order == state layout, just transpose ------
    wfc_t = jnp.asarray(w_fc, f32).T                      # (2H, r_dim)
    bfc2 = jnp.asarray(b_fc, f32)[None, :]                # (1, r_dim)

    # ---- time-chunked streaming pallas_call ----------------------------------
    step_bytes = B * 8 * H * jnp.dtype(gate_dtype).itemsize
    Tt = _pick_time_chunk(T, step_bytes)
    grid = (T // Tt,)

    # Explicit VMEM budget: double-buffered inputs + output + scratch + headroom.
    in_bytes = (Tt * step_bytes
                + w_comb.size * 4 + wfc_t.size * 4 + bfc2.size * 4)
    needed = 2 * in_bytes + B * r_dim * 4 + 2 * (B * 2 * H * 4) + (4 << 20)
    vmem_limit = int(min(max(needed, 32 << 20), 128 << 20))

    out = pl.pallas_call(
        bilstm_kernel,
        out_shape=jax.ShapeDtypeStruct((B, r_dim), f32),
        grid_spec=pltpu.PrefetchScalarGridSpec(
            num_scalar_prefetch=0,
            grid=grid,
            in_specs=[
                pl.BlockSpec((Tt, B, 8 * H), lambda t: (t, 0, 0)),  # streamed gate chunks
                pl.BlockSpec((2 * H, 8 * H), lambda t: (0, 0)),     # recurrent weight (resident)
                pl.BlockSpec((2 * H, r_dim), lambda t: (0, 0)),     # FC weight
                pl.BlockSpec((1, r_dim), lambda t: (0, 0)),         # FC bias
            ],
            out_specs=pl.BlockSpec((B, r_dim), lambda t: (0, 0)),
            scratch_shapes=[pltpu.VMEM((B, 2 * H), f32),            # h carry
                            pltpu.VMEM((B, 2 * H), f32)],           # c carry
        ),
        compiler_params=pltpu.CompilerParams(
            dimension_semantics=("arbitrary",),   # serial recurrence over time
            vmem_limit_bytes=vmem_limit,
        ),
    )(gin_comb, w_comb, wfc_t, bfc2)
    # TODO(synk): on v7x (2 TCs/chip) the two directions could instead be split
    # across cores via grid=(2,) + dimension_semantics=("parallel",) for ~2x on
    # the serial recurrence; the fused single-core form above is best on v5e/v6e.
    return out


# ---------------------------------------------------------------------------
# Deterministic parameter init (matches nn.LSTM / nn.Linear shapes)
# ---------------------------------------------------------------------------
def init_params(key, y_dim, h_dim, r_dim):
    ks = jax.random.split(key, 10)
    u = lambda k, shape, bound: jax.random.uniform(
        k, shape, jnp.float32, minval=-bound, maxval=bound)
    kb = 1.0 / float(jnp.sqrt(jnp.float32(h_dim)))
    kf = 1.0 / float(jnp.sqrt(jnp.float32(2 * h_dim)))
    wih_f = u(ks[0], (4 * h_dim, y_dim), kb)
    whh_f = u(ks[1], (4 * h_dim, h_dim), kb)
    bih_f = u(ks[2], (4 * h_dim,), kb)
    bhh_f = u(ks[3], (4 * h_dim,), kb)
    wih_b = u(ks[4], (4 * h_dim, y_dim), kb)
    whh_b = u(ks[5], (4 * h_dim, h_dim), kb)
    bih_b = u(ks[6], (4 * h_dim,), kb)
    bhh_b = u(ks[7], (4 * h_dim,), kb)
    w_fc = u(ks[8], (r_dim, 2 * h_dim), kf)
    b_fc = u(ks[9], (r_dim,), kf)
    return (wih_f, whh_f, bih_f, bhh_f,
            wih_b, whh_b, bih_b, bhh_b,
            w_fc, b_fc)


# ---------------------------------------------------------------------------
# Pure-JAX reference (mirrors torch.nn.LSTM bidirectional semantics)
# ---------------------------------------------------------------------------
def reference(y, params, h_dim, r_dim):
    (wih_f, whh_f, bih_f, bhh_f,
     wih_b, whh_b, bih_b, bhh_b,
     w_fc, b_fc) = params
    B, T, D = y.shape
    H = h_dim

    def cell(y_t, h, c, wih, whh, b):
        gates = y_t @ wih.T + h @ whh.T + b
        i = jax.nn.sigmoid(gates[:, :H])
        f = jax.nn.sigmoid(gates[:, H:2 * H])
        g = jnp.tanh(gates[:, 2 * H:3 * H])
        o = jax.nn.sigmoid(gates[:, 3 * H:])
        c = f * c + i * g
        h = o * jnp.tanh(c)
        return h, c

    h_f = c_f = jnp.zeros((B, H), jnp.float32)
    for t in range(T):
        h_f, c_f = cell(y[:, t], h_f, c_f, wih_f, whh_f, bih_f + bhh_f)
    h_b = c_b = jnp.zeros((B, H), jnp.float32)
    for t in range(T - 1, -1, -1):
        h_b, c_b = cell(y[:, t], h_b, c_b, wih_b, whh_b, bih_b + bhh_b)
    feat = jnp.concatenate([h_f, h_b], axis=-1)
    return feat @ w_fc.T + b_fc


# ---------------------------------------------------------------------------
if __name__ == "__main__":
    B, T = 2, 8
    x_dim, y_dim, h_dim, r_dim = 3, 4, 32, 16

    key = jax.random.PRNGKey(0)
    kx, ky, kp = jax.random.split(key, 3)
    x = jax.random.normal(kx, (B, T, x_dim), jnp.float32)
    y = jax.random.normal(ky, (B, T, y_dim), jnp.float32)
    params = init_params(kp, y_dim, h_dim, r_dim)

    out = bilstm_encoder_last_op(x, y, params, h_dim=h_dim, r_dim=r_dim)
    out = jax.block_until_ready(out)

    ref = reference(y, params, h_dim, r_dim)
    assert out.shape == (B, r_dim), out.shape
    assert jnp.allclose(out, ref, atol=1e-4, rtol=1e-4), (out, ref)

    print("KERNEL_OK")
</pallas_src>

<mosaic_0001>
module attributes {stable_mosaic.version = 11 : i64} {
  func.func @bilstm_kernel(%arg0: i32, %arg1: memref<8x2x256xf32, #tpu.memory_space<vmem>>, %arg2: memref<64x256xf32, #tpu.memory_space<vmem>>, %arg3: memref<64x16xf32, #tpu.memory_space<vmem>>, %arg4: memref<1x16xf32, #tpu.memory_space<vmem>>, %arg5: memref<2x16xf32, #tpu.memory_space<vmem>>, %arg6: memref<2x64xf32, #tpu.memory_space<vmem>>, %arg7: memref<2x64xf32, #tpu.memory_space<vmem>>) attributes {dimension_semantics = [#tpu.dimension_semantics<arbitrary>], iteration_bounds = array<i64: 1>, scalar_prefetch = 0 : i64, scratch_operands = 2 : i64, tpu.core_type = #tpu.core_type<tc>, window_params = [{transform_indices = @transform_0, window_bounds = array<i64: 8, 2, 256>}, {pipeline_mode = #tpu.pipeline_mode<synchronous>, transform_indices = @transform_1, window_bounds = array<i64: 64, 256>}, {pipeline_mode = #tpu.pipeline_mode<synchronous>, transform_indices = @transform_2, window_bounds = array<i64: 64, 16>}, {pipeline_mode = #tpu.pipeline_mode<synchronous>, transform_indices = @transform_3, window_bounds = array<i64: 1, 16>}, {pipeline_mode = #tpu.pipeline_mode<synchronous>, transform_indices = @transform_4, window_bounds = array<i64: 2, 16>}]} {
    %c0_i32 = arith.constant 0 : i32
    %0 = arith.cmpi eq, %arg0, %c0_i32 : i32
    %1 = arith.extui %0 : i1 to i32
    %c0_i32_0 = arith.constant 0 : i32
    %2 = arith.cmpi ne, %1, %c0_i32_0 : i32
    scf.if %2 {
      %cst_58 = arith.constant 0.000000e+00 : f32
      %186 = vector.broadcast %cst_58 : f32 to vector<2x64xf32>
      %c0_59 = arith.constant 0 : index
      %c0_60 = arith.constant 0 : index
      %187 = vector.load %arg6[%c0_59, %c0_60] : memref<2x64xf32, #tpu.memory_space<vmem>>, vector<2x64xf32>
      tpu.vector_store %arg6[%c0_59, %c0_60], %186 {strides = array<i32>} : memref<2x64xf32, #tpu.memory_space<vmem>>, vector<2x64xf32>,
      %cst_61 = arith.constant 0.000000e+00 : f32
      %188 = vector.broadcast %cst_61 : f32 to vector<2x64xf32>
      %c0_62 = arith.constant 0 : index
      %c0_63 = arith.constant 0 : index
      %189 = vector.load %arg7[%c0_62, %c0_63] : memref<2x64xf32, #tpu.memory_space<vmem>>, vector<2x64xf32>
      tpu.vector_store %arg7[%c0_62, %c0_63], %188 {strides = array<i32>} : memref<2x64xf32, #tpu.memory_space<vmem>>, vector<2x64xf32>,
    } else {
    }
    %c0 = arith.constant 0 : index
    %c0_1 = arith.constant 0 : index
    %3 = vector.load %arg6[%c0, %c0_1] : memref<2x64xf32, #tpu.memory_space<vmem>>, vector<2x64xf32>
    %c0_2 = arith.constant 0 : index
    %c0_3 = arith.constant 0 : index
    %4 = vector.load %arg7[%c0_2, %c0_3] : memref<2x64xf32, #tpu.memory_space<vmem>>, vector<2x64xf32>
    %c0_i32_4 = arith.constant 0 : i32
    %5 = arith.index_cast %c0_i32_4 : i32 to index
    %c0_5 = arith.constant 0 : index
    %c0_6 = arith.constant 0 : index
    %6 = vector.load %arg1[%5, %c0_5, %c0_6] : memref<8x2x256xf32, #tpu.memory_space<vmem>>, vector<1x2x256xf32>
    %7 = vector.shape_cast %6 : vector<1x2x256xf32> to vector<2x256xf32>
    %c0_7 = arith.constant 0 : index
    %c0_8 = arith.constant 0 : index
    %8 = vector.load %arg2[%c0_7, %c0_8] : memref<64x256xf32, #tpu.memory_space<vmem>>, vector<64x256xf32>
    %cst = arith.constant dense<0.000000e+00> : vector<2x256xf32>
    %9 = tpu.matmul %3, %8, %cst {dimension_numbers = #tpu.dot_dimension_numbers<[1], [0], [0], [1], [0, 0, 1, 1], [], []>} : vector<2x64xf32>, vector<64x256xf32>, vector<2x256xf32> -> vector<2x256xf32>
    %10 = arith.addf %7, %9 : vector<2x256xf32>
    %11 = vector.extract_strided_slice %10 {offsets = [0, 0], sizes = [2, 192], strides = [1, 1]} : vector<2x256xf32> to vector<2x192xf32>
    %12 = arith.negf %11 : vector<2x192xf32>
    %13 = math.exp %12 : vector<2x192xf32>
    %cst_9 = arith.constant 1.000000e+00 : f32
    %14 = vector.broadcast %cst_9 : f32 to vector<2x192xf32>
    %15 = arith.addf %14, %13 : vector<2x192xf32>
    %16 = arith.divf %14, %15 : vector<2x192xf32>
    %17 = vector.extract_strided_slice %10 {offsets = [0, 192], sizes = [2, 64], strides = [1, 1]} : vector<2x256xf32> to vector<2x64xf32>
    %18 = math.tanh %17 : vector<2x64xf32>
    %19 = vector.extract_strided_slice %16 {offsets = [0, 0], sizes = [2, 64], strides = [1, 1]} : vector<2x192xf32> to vector<2x64xf32>
    %20 = vector.extract_strided_slice %16 {offsets = [0, 64], sizes = [2, 64], strides = [1, 1]} : vector<2x192xf32> to vector<2x64xf32>
    %21 = vector.extract_strided_slice %16 {offsets = [0, 128], sizes = [2, 64], strides = [1, 1]} : vector<2x192xf32> to vector<2x64xf32>
    %22 = arith.mulf %20, %4 : vector<2x64xf32>
    %23 = arith.mulf %19, %18 : vector<2x64xf32>
    %24 = arith.addf %22, %23 : vector<2x64xf32>
    %25 = math.tanh %24 : vector<2x64xf32>
    %26 = arith.mulf %21, %25 : vector<2x64xf32>
    %c1_i32 = arith.constant 1 : i32
    %27 = arith.index_cast %c1_i32 : i32 to index
    %c0_10 = arith.constant 0 : index
    %c0_11 = arith.constant 0 : index
    %28 = vector.load %arg1[%27, %c0_10, %c0_11] : memref<8x2x256xf32, #tpu.memory_space<vmem>>, vector<1x2x256xf32>
    %29 = vector.shape_cast %28 : vector<1x2x256xf32> to vector<2x256xf32>
    %c0_12 = arith.constant 0 : index
    %c0_13 = arith.constant 0 : index
    %30 = vector.load %arg2[%c0_12, %c0_13] : memref<64x256xf32, #tpu.memory_space<vmem>>, vector<64x256xf32>
    %cst_14 = arith.constant dense<0.000000e+00> : vector<2x256xf32>
    %31 = tpu.matmul %26, %30, %cst_14 {dimension_numbers = #tpu.dot_dimension_numbers<[1], [0], [0], [1], [0, 0, 1, 1], [], []>} : vector<2x64xf32>, vector<64x256xf32>, vector<2x256xf32> -> vector<2x256xf32>
    %32 = arith.addf %29, %31 : vector<2x256xf32>
    %33 = vector.extract_strided_slice %32 {offsets = [0, 0], sizes = [2, 192], strides = [1, 1]} : vector<2x256xf32> to vector<2x192xf32>
    %34 = arith.negf %33 : vector<2x192xf32>
    %35 = math.exp %34 : vector<2x192xf32>
    %cst_15 = arith.constant 1.000000e+00 : f32
    %36 = vector.broadcast %cst_15 : f32 to vector<2x192xf32>
    %37 = arith.addf %36, %35 : vector<2x192xf32>
    %38 = arith.divf %36, %37 : vector<2x192xf32>
    %39 = vector.extract_strided_slice %32 {offsets = [0, 192], sizes = [2, 64], strides = [1, 1]} : vector<2x256xf32> to vector<2x64xf32>
    %40 = math.tanh %39 : vector<2x64xf32>
    %41 = vector.extract_strided_slice %38 {offsets = [0, 0], sizes = [2, 64], strides = [1, 1]} : vector<2x192xf32> to vector<2x64xf32>
    %42 = vector.extract_strided_slice %38 {offsets = [0, 64], sizes = [2, 64], strides = [1, 1]} : vector<2x192xf32> to vector<2x64xf32>
    %43 = vector.extract_strided_slice %38 {offsets = [0, 128], sizes = [2, 64], strides = [1, 1]} : vector<2x192xf32> to vector<2x64xf32>
    %44 = arith.mulf %42, %24 : vector<2x64xf32>
    %45 = arith.mulf %41, %40 : vector<2x64xf32>
    %46 = arith.addf %44, %45 : vector<2x64xf32>
    %47 = math.tanh %46 : vector<2x64xf32>
    %48 = arith.mulf %43, %47 : vector<2x64xf32>
    %c2_i32 = arith.constant 2 : i32
    %49 = arith.index_cast %c2_i32 : i32 to index
    %c0_16 = arith.constant 0 : index
    %c0_17 = arith.constant 0 : index
    %50 = vector.load %arg1[%49, %c0_16, %c0_17] : memref<8x2x256xf32, #tpu.memory_space<vmem>>, vector<1x2x256xf32>
    %51 = vector.shape_cast %50 : vector<1x2x256xf32> to vector<2x256xf32>
    %c0_18 = arith.constant 0 : index
    %c0_19 = arith.constant 0 : index
    %52 = vector.load %arg2[%c0_18, %c0_19] : memref<64x256xf32, #tpu.memory_space<vmem>>, vector<64x256xf32>
    %cst_20 = arith.constant dense<0.000000e+00> : vector<2x256xf32>
    %53 = tpu.matmul %48, %52, %cst_20 {dimension_numbers = #tpu.dot_dimension_numbers<[1], [0], [0], [1], [0, 0, 1, 1], [], []>} : vector<2x64xf32>, vector<64x256xf32>, vector<2x256xf32> -> vector<2x256xf32>
    %54 = arith.addf %51, %53 : vector<2x256xf32>
    %55 = vector.extract_strided_slice %54 {offsets = [0, 0], sizes = [2, 192], strides = [1, 1]} : vector<2x256xf32> to vector<2x192xf32>
    %56 = arith.negf %55 : vector<2x192xf32>
    %57 = math.exp %56 : vector<2x192xf32>
    %cst_21 = arith.constant 1.000000e+00 : f32
    %58 = vector.broadcast %cst_21 : f32 to vector<2x192xf32>
    %59 = arith.addf %58, %57 : vector<2x192xf32>
    %60 = arith.divf %58, %59 : vector<2x192xf32>
    %61 = vector.extract_strided_slice %54 {offsets = [0, 192], sizes = [2, 64], strides = [1, 1]} : vector<2x256xf32> to vector<2x64xf32>
    %62 = math.tanh %61 : vector<2x64xf32>
    %63 = vector.extract_strided_slice %60 {offsets = [0, 0], sizes = [2, 64], strides = [1, 1]} : vector<2x192xf32> to vector<2x64xf32>
    %64 = vector.extract_strided_slice %60 {offsets = [0, 64], sizes = [2, 64], strides = [1, 1]} : vector<2x192xf32> to vector<2x64xf32>
    %65 = vector.extract_strided_slice %60 {offsets = [0, 128], sizes = [2, 64], strides = [1, 1]} : vector<2x192xf32> to vector<2x64xf32>
    %66 = arith.mulf %64, %46 : vector<2x64xf32>
    %67 = arith.mulf %63, %62 : vector<2x64xf32>
    %68 = arith.addf %66, %67 : vector<2x64xf32>
    %69 = math.tanh %68 : vector<2x64xf32>
    %70 = arith.mulf %65, %69 : vector<2x64xf32>
    %c3_i32 = arith.constant 3 : i32
    %71 = arith.index_cast %c3_i32 : i32 to index
    %c0_22 = arith.constant 0 : index
    %c0_23 = arith.constant 0 : index
    %72 = vector.load %arg1[%71, %c0_22, %c0_23] : memref<8x2x256xf32, #tpu.memory_space<vmem>>, vector<1x2x256xf32>
    %73 = vector.shape_cast %72 : vector<1x2x256xf32> to vector<2x256xf32>
    %c0_24 = arith.constant 0 : index
    %c0_25 = arith.constant 0 : index
    %74 = vector.load %arg2[%c0_24, %c0_25] : memref<64x256xf32, #tpu.memory_space<vmem>>, vector<64x256xf32>
    %cst_26 = arith.constant dense<0.000000e+00> : vector<2x256xf32>
    %75 = tpu.matmul %70, %74, %cst_26 {dimension_numbers = #tpu.dot_dimension_numbers<[1], [0], [0], [1], [0, 0, 1, 1], [], []>} : vector<2x64xf32>, vector<64x256xf32>, vector<2x256xf32> -> vector<2x256xf32>
    %76 = arith.addf %73, %75 : vector<2x256xf32>
    %77 = vector.extract_strided_slice %76 {offsets = [0, 0], sizes = [2, 192], strides = [1, 1]} : vector<2x256xf32> to vector<2x192xf32>
    %78 = arith.negf %77 : vector<2x192xf32>
    %79 = math.exp %78 : vector<2x192xf32>
    %cst_27 = arith.constant 1.000000e+00 : f32
    %80 = vector.broadcast %cst_27 : f32 to vector<2x192xf32>
    %81 = arith.addf %80, %79 : vector<2x192xf32>
    %82 = arith.divf %80, %81 : vector<2x192xf32>
    %83 = vector.extract_strided_slice %76 {offsets = [0, 192], sizes = [2, 64], strides = [1, 1]} : vector<2x256xf32> to vector<2x64xf32>
    %84 = math.tanh %83 : vector<2x64xf32>
    %85 = vector.extract_strided_slice %82 {offsets = [0, 0], sizes = [2, 64], strides = [1, 1]} : vector<2x192xf32> to vector<2x64xf32>
    %86 = vector.extract_strided_slice %82 {offsets = [0, 64], sizes = [2, 64], strides = [1, 1]} : vector<2x192xf32> to vector<2x64xf32>
    %87 = vector.extract_strided_slice %82 {offsets = [0, 128], sizes = [2, 64], strides = [1, 1]} : vector<2x192xf32> to vector<2x64xf32>
    %88 = arith.mulf %86, %68 : vector<2x64xf32>
    %89 = arith.mulf %85, %84 : vector<2x64xf32>
    %90 = arith.addf %88, %89 : vector<2x64xf32>
    %91 = math.tanh %90 : vector<2x64xf32>
    %92 = arith.mulf %87, %91 : vector<2x64xf32>
    %c4_i32 = arith.constant 4 : i32
    %93 = arith.index_cast %c4_i32 : i32 to index
    %c0_28 = arith.constant 0 : index
    %c0_29 = arith.constant 0 : index
    %94 = vector.load %arg1[%93, %c0_28, %c0_29] : memref<8x2x256xf32, #tpu.memory_space<vmem>>, vector<1x2x256xf32>
    %95 = vector.shape_cast %94 : vector<1x2x256xf32> to vector<2x256xf32>
    %c0_30 = arith.constant 0 : index
    %c0_31 = arith.constant 0 : index
    %96 = vector.load %arg2[%c0_30, %c0_31] : memref<64x256xf32, #tpu.memory_space<vmem>>, vector<64x256xf32>
    %cst_32 = arith.constant dense<0.000000e+00> : vector<2x256xf32>
    %97 = tpu.matmul %92, %96, %cst_32 {dimension_numbers = #tpu.dot_dimension_numbers<[1], [0], [0], [1], [0, 0, 1, 1], [], []>} : vector<2x64xf32>, vector<64x256xf32>, vector<2x256xf32> -> vector<2x256xf32>
    %98 = arith.addf %95, %97 : vector<2x256xf32>
    %99 = vector.extract_strided_slice %98 {offsets = [0, 0], sizes = [2, 192], strides = [1, 1]} : vector<2x256xf32> to vector<2x192xf32>
    %100 = arith.negf %99 : vector<2x192xf32>
    %101 = math.exp %100 : vector<2x192xf32>
    %cst_33 = arith.constant 1.000000e+00 : f32
    %102 = vector.broadcast %cst_33 : f32 to vector<2x192xf32>
    %103 = arith.addf %102, %101 : vector<2x192xf32>
    %104 = arith.divf %102, %103 : vector<2x192xf32>
    %105 = vector.extract_strided_slice %98 {offsets = [0, 192], sizes = [2, 64], strides = [1, 1]} : vector<2x256xf32> to vector<2x64xf32>
    %106 = math.tanh %105 : vector<2x64xf32>
    %107 = vector.extract_strided_slice %104 {offsets = [0, 0], sizes = [2, 64], strides = [1, 1]} : vector<2x192xf32> to vector<2x64xf32>
    %108 = vector.extract_strided_slice %104 {offsets = [0, 64], sizes = [2, 64], strides = [1, 1]} : vector<2x192xf32> to vector<2x64xf32>
    %109 = vector.extract_strided_slice %104 {offsets = [0, 128], sizes = [2, 64], strides = [1, 1]} : vector<2x192xf32> to vector<2x64xf32>
    %110 = arith.mulf %108, %90 : vector<2x64xf32>
    %111 = arith.mulf %107, %106 : vector<2x64xf32>
    %112 = arith.addf %110, %111 : vector<2x64xf32>
    %113 = math.tanh %112 : vector<2x64xf32>
    %114 = arith.mulf %109, %113 : vector<2x64xf32>
    %c5_i32 = arith.constant 5 : i32
    %115 = arith.index_cast %c5_i32 : i32 to index
    %c0_34 = arith.constant 0 : index
    %c0_35 = arith.constant 0 : index
    %116 = vector.load %arg1[%115, %c0_34, %c0_35] : memref<8x2x256xf32, #tpu.memory_space<vmem>>, vector<1x2x256xf32>
    %117 = vector.shape_cast %116 : vector<1x2x256xf32> to vector<2x256xf32>
    %c0_36 = arith.constant 0 : index
    %c0_37 = arith.constant 0 : index
    %118 = vector.load %arg2[%c0_36, %c0_37] : memref<64x256xf32, #tpu.memory_space<vmem>>, vector<64x256xf32>
    %cst_38 = arith.constant dense<0.000000e+00> : vector<2x256xf32>
    %119 = tpu.matmul %114, %118, %cst_38 {dimension_numbers = #tpu.dot_dimension_numbers<[1], [0], [0], [1], [0, 0, 1, 1], [], []>} : vector<2x64xf32>, vector<64x256xf32>, vector<2x256xf32> -> vector<2x256xf32>
    %120 = arith.addf %117, %119 : vector<2x256xf32>
    %121 = vector.extract_strided_slice %120 {offsets = [0, 0], sizes = [2, 192], strides = [1, 1]} : vector<2x256xf32> to vector<2x192xf32>
    %122 = arith.negf %121 : vector<2x192xf32>
    %123 = math.exp %122 : vector<2x192xf32>
    %cst_39 = arith.constant 1.000000e+00 : f32
    %124 = vector.broadcast %cst_39 : f32 to vector<2x192xf32>
    %125 = arith.addf %124, %123 : vector<2x192xf32>
    %126 = arith.divf %124, %125 : vector<2x192xf32>
    %127 = vector.extract_strided_slice %120 {offsets = [0, 192], sizes = [2, 64], strides = [1, 1]} : vector<2x256xf32> to vector<2x64xf32>
    %128 = math.tanh %127 : vector<2x64xf32>
    %129 = vector.extract_strided_slice %126 {offsets = [0, 0], sizes = [2, 64], strides = [1, 1]} : vector<2x192xf32> to vector<2x64xf32>
    %130 = vector.extract_strided_slice %126 {offsets = [0, 64], sizes = [2, 64], strides = [1, 1]} : vector<2x192xf32> to vector<2x64xf32>
    %131 = vector.extract_strided_slice %126 {offsets = [0, 128], sizes = [2, 64], strides = [1, 1]} : vector<2x192xf32> to vector<2x64xf32>
    %132 = arith.mulf %130, %112 : vector<2x64xf32>
    %133 = arith.mulf %129, %128 : vector<2x64xf32>
    %134 = arith.addf %132, %133 : vector<2x64xf32>
    %135 = math.tanh %134 : vector<2x64xf32>
    %136 = arith.mulf %131, %135 : vector<2x64xf32>
    %c6_i32 = arith.constant 6 : i32
    %137 = arith.index_cast %c6_i32 : i32 to index
    %c0_40 = arith.constant 0 : index
    %c0_41 = arith.constant 0 : index
    %138 = vector.load %arg1[%137, %c0_40, %c0_41] : memref<8x2x256xf32, #tpu.memory_space<vmem>>, vector<1x2x256xf32>
    %139 = vector.shape_cast %138 : vector<1x2x256xf32> to vector<2x256xf32>
    %c0_42 = arith.constant 0 : index
    %c0_43 = arith.constant 0 : index
    %140 = vector.load %arg2[%c0_42, %c0_43] : memref<64x256xf32, #tpu.memory_space<vmem>>, vector<64x256xf32>
    %cst_44 = arith.constant dense<0.000000e+00> : vector<2x256xf32>
    %141 = tpu.matmul %136, %140, %cst_44 {dimension_numbers = #tpu.dot_dimension_numbers<[1], [0], [0], [1], [0, 0, 1, 1], [], []>} : vector<2x64xf32>, vector<64x256xf32>, vector<2x256xf32> -> vector<2x256xf32>
    %142 = arith.addf %139, %141 : vector<2x256xf32>
    %143 = vector.extract_strided_slice %142 {offsets = [0, 0], sizes = [2, 192], strides = [1, 1]} : vector<2x256xf32> to vector<2x192xf32>
    %144 = arith.negf %143 : vector<2x192xf32>
    %145 = math.exp %144 : vector<2x192xf32>
    %cst_45 = arith.constant 1.000000e+00 : f32
    %146 = vector.broadcast %cst_45 : f32 to vector<2x192xf32>
    %147 = arith.addf %146, %145 : vector<2x192xf32>
    %148 = arith.divf %146, %147 : vector<2x192xf32>
    %149 = vector.extract_strided_slice %142 {offsets = [0, 192], sizes = [2, 64], strides = [1, 1]} : vector<2x256xf32> to vector<2x64xf32>
    %150 = math.tanh %149 : vector<2x64xf32>
    %151 = vector.extract_strided_slice %148 {offsets = [0, 0], sizes = [2, 64], strides = [1, 1]} : vector<2x192xf32> to vector<2x64xf32>
    %152 = vector.extract_strided_slice %148 {offsets = [0, 64], sizes = [2, 64], strides = [1, 1]} : vector<2x192xf32> to vector<2x64xf32>
    %153 = vector.extract_strided_slice %148 {offsets = [0, 128], sizes = [2, 64], strides = [1, 1]} : vector<2x192xf32> to vector<2x64xf32>
    %154 = arith.mulf %152, %134 : vector<2x64xf32>
    %155 = arith.mulf %151, %150 : vector<2x64xf32>
    %156 = arith.addf %154, %155 : vector<2x64xf32>
    %157 = math.tanh %156 : vector<2x64xf32>
    %158 = arith.mulf %153, %157 : vector<2x64xf32>
    %c7_i32 = arith.constant 7 : i32
    %159 = arith.index_cast %c7_i32 : i32 to index
    %c0_46 = arith.constant 0 : index
    %c0_47 = arith.constant 0 : index
    %160 = vector.load %arg1[%159, %c0_46, %c0_47] : memref<8x2x256xf32, #tpu.memory_space<vmem>>, vector<1x2x256xf32>
    %161 = vector.shape_cast %160 : vector<1x2x256xf32> to vector<2x256xf32>
    %c0_48 = arith.constant 0 : index
    %c0_49 = arith.constant 0 : index
    %162 = vector.load %arg2[%c0_48, %c0_49] : memref<64x256xf32, #tpu.memory_space<vmem>>, vector<64x256xf32>
    %cst_50 = arith.constant dense<0.000000e+00> : vector<2x256xf32>
    %163 = tpu.matmul %158, %162, %cst_50 {dimension_numbers = #tpu.dot_dimension_numbers<[1], [0], [0], [1], [0, 0, 1, 1], [], []>} : vector<2x64xf32>, vector<64x256xf32>, vector<2x256xf32> -> vector<2x256xf32>
    %164 = arith.addf %161, %163 : vector<2x256xf32>
    %165 = vector.extract_strided_slice %164 {offsets = [0, 0], sizes = [2, 192], strides = [1, 1]} : vector<2x256xf32> to vector<2x192xf32>
    %166 = arith.negf %165 : vector<2x192xf32>
    %167 = math.exp %166 : vector<2x192xf32>
    %cst_51 = arith.constant 1.000000e+00 : f32
    %168 = vector.broadcast %cst_51 : f32 to vector<2x192xf32>
    %169 = arith.addf %168, %167 : vector<2x192xf32>
    %170 = arith.divf %168, %169 : vector<2x192xf32>
    %171 = vector.extract_strided_slice %164 {offsets = [0, 192], sizes = [2, 64], strides = [1, 1]} : vector<2x256xf32> to vector<2x64xf32>
    %172 = math.tanh %171 : vector<2x64xf32>
    %173 = vector.extract_strided_slice %170 {offsets = [0, 0], sizes = [2, 64], strides = [1, 1]} : vector<2x192xf32> to vector<2x64xf32>
    %174 = vector.extract_strided_slice %170 {offsets = [0, 64], sizes = [2, 64], strides = [1, 1]} : vector<2x192xf32> to vector<2x64xf32>
    %175 = vector.extract_strided_slice %170 {offsets = [0, 128], sizes = [2, 64], strides = [1, 1]} : vector<2x192xf32> to vector<2x64xf32>
    %176 = arith.mulf %174, %156 : vector<2x64xf32>
    %177 = arith.mulf %173, %172 : vector<2x64xf32>
    %178 = arith.addf %176, %177 : vector<2x64xf32>
    %179 = math.tanh %178 : vector<2x64xf32>
    %180 = arith.mulf %175, %179 : vector<2x64xf32>
    %c8_i32 = arith.constant 8 : i32
    %c0_52 = arith.constant 0 : index
    %c0_53 = arith.constant 0 : index
    %181 = vector.load %arg6[%c0_52, %c0_53] : memref<2x64xf32, #tpu.memory_space<vmem>>, vector<2x64xf32>
    tpu.vector_store %arg6[%c0_52, %c0_53], %180 {strides = array<i32>} : memref<2x64xf32, #tpu.memory_space<vmem>>, vector<2x64xf32>,
    %c0_54 = arith.constant 0 : index
    %c0_55 = arith.constant 0 : index
    %182 = vector.load %arg7[%c0_54, %c0_55] : memref<2x64xf32, #tpu.memory_space<vmem>>, vector<2x64xf32>
    tpu.vector_store %arg7[%c0_54, %c0_55], %178 {strides = array<i32>} : memref<2x64xf32, #tpu.memory_space<vmem>>, vector<2x64xf32>,
    %c0_i32_56 = arith.constant 0 : i32
    %183 = arith.cmpi eq, %arg0, %c0_i32_56 : i32
    %184 = arith.extui %183 : i1 to i32
    %c0_i32_57 = arith.constant 0 : i32
    %185 = arith.cmpi ne, %184, %c0_i32_57 : i32
    scf.if %185 {
      %c0_58 = arith.constant 0 : index
      %c0_59 = arith.constant 0 : index
      %186 = vector.load %arg3[%c0_58, %c0_59] : memref<64x16xf32, #tpu.memory_space<vmem>>, vector<64x16xf32>
      %cst_60 = arith.constant dense<0.000000e+00> : vector<2x16xf32>
      %187 = tpu.matmul %180, %186, %cst_60 {dimension_numbers = #tpu.dot_dimension_numbers<[1], [0], [0], [1], [0, 0, 1, 1], [], []>} : vector<2x64xf32>, vector<64x16xf32>, vector<2x16xf32> -> vector<2x16xf32>
      %c0_61 = arith.constant 0 : index
      %c0_62 = arith.constant 0 : index
      %188 = vector.load %arg4[%c0_61, %c0_62] : memref<1x16xf32, #tpu.memory_space<vmem>>, vector<1x16xf32>
      %189 = vector.broadcast %188 : vector<1x16xf32> to vector<2x16xf32>
      %190 = arith.addf %187, %189 : vector<2x16xf32>
      %c0_63 = arith.constant 0 : index
      %c0_64 = arith.constant 0 : index
      %191 = vector.load %arg5[%c0_63, %c0_64] : memref<2x16xf32, #tpu.memory_space<vmem>>, vector<2x16xf32>
      tpu.vector_store %arg5[%c0_63, %c0_64], %190 {strides = array<i32>} : memref<2x16xf32, #tpu.memory_space<vmem>>, vector<2x16xf32>,
    } else {
    }
    return
  }
  func.func @transform_0(%arg0: i32) -> (i32, i32, i32) {
    %c0_i32 = arith.constant 0 : i32
    %c0_i32_0 = arith.constant 0 : i32
    %c0_i32_1 = arith.constant 0 : i32
    return %arg0, %c0_i32, %c0_i32_0 : i32, i32, i32
  }
  func.func @transform_1(%arg0: i32) -> (i32, i32) {
    %c0_i32 = arith.constant 0 : i32
    %c0_i32_0 = arith.constant 0 : i32
    %c0_i32_1 = arith.constant 0 : i32
    return %c0_i32, %c0_i32_0 : i32, i32
  }
  func.func @transform_2(%arg0: i32) -> (i32, i32) {
    %c0_i32 = arith.constant 0 : i32
    %c0_i32_0 = arith.constant 0 : i32
    %c0_i32_1 = arith.constant 0 : i32
    return %c0_i32, %c0_i32_0 : i32, i32
  }
  func.func @transform_3(%arg0: i32) -> (i32, i32) {
    %c0_i32 = arith.constant 0 : i32
    %c0_i32_0 = arith.constant 0 : i32
    %c0_i32_1 = arith.constant 0 : i32
    return %c0_i32, %c0_i32_0 : i32, i32
  }
  func.func @transform_4(%arg0: i32) -> (i32, i32) {
    %c0_i32 = arith.constant 0 : i32
    %c0_i32_0 = arith.constant 0 : i32
    %c0_i32_1 = arith.constant 0 : i32
    return %c0_i32, %c0_i32_0 : i32, i32
  }
}

</mosaic_0001>

<bundles_post_ra>
// kernel: tpu_custom_call.1
= control target key start
LH: loop header
LB: loop body
LE: loop exit
PB: predicated region body
PF: predicated region fallthrough
CT: control target
= control target key end

     0   :  { %9 = vsyncpa [#allocation5], 0  ;;  %s1683_s0 = inlined_call_operand.vmem [shape: f32[8,2,256], index: 0, kind: input, shape index: {}]   ;;  %s1684_s1 = inlined_call_operand.hbm [shape: f32[64,256], index: 1, kind: input, shape index: {}]   ;;  %s1685_s2 = inlined_call_operand.vmem [shape: f32[64,16], index: 2, kind: input, shape index: {}]   ;;  %s1686_s3 = inlined_call_operand.vmem [shape: f32[1,16], index: 3, kind: input, shape index: {}]   ;;  %s1687_s4 = inlined_call_operand.hbm [shape: f32[2,16], index: 4, kind: output, shape index: {}]  }
   0x1   :  { %10 = vsyncpa [#allocation6], 0  ;;  %s1433_s15 = smov [#allocation4]   ;;  %s1385_s19 = scalar_lea.hbm %s1684_s1, 2048 }
   0x2   :  { %s18_s16 = sshll.u32 %s1433_s15, 4  ;;  %p1386_p0 = scmp.ne.s32.totalorder %s1684_s1, %s1385_s19  ;;  %s19_s16 = int_to_ptr.vmem [resolvable:$true] %s18_s16 }
   0x3   :  { %p1389_p1 = scmp.lt.u32.totalorder %s1385_s19, %s1684_s1 }
   0x5   :  { %p1391_p2 = pnand %p1389_p1, %p1386_p0 }
   0x7   :  { %1394 = shalt.err (!%p1391_p2)
}
   0x8   :  { %s1395_s24 = scalar_lea.vmem %s19_s16, 2048  ;;  %p1400_p4 = scmp.lt.s32.totalorder %s19_s16, %s19_s16 }
   0x9   :  { %p1396_p3 = scmp.ne.s32.totalorder %s19_s16, %s1395_s24  ;;  %p1401_p5 = scmp.lt.s32.totalorder %s1395_s24, %s1395_s24 }
   0xb   :  { %p1402_p6 = por %p1401_p5, %p1400_p4 }
   0xd   :  { %p1403_p7 = pnand %p1402_p6, %p1396_p3 }
   0xf   :  { %1406 = shalt.err (!%p1403_p7)
}
  0x10   :  { %s1434_s25 = smov 256   ;;  %s1435_s26 = smov 16  }
  0x11   :  { %24 = dma.hbm_to_vmem [thread:$0]  %s1684_s1, 2048, %s19_s16, [#allocation5], %s1434_s25, %s1434_s25, %s1435_s26  }
  0x12   :  { %1429 = dma.done.wait [#allocation5], 2048  }
  0x13   :  { %1430 = vsyncadd [#allocation5], 4294965248  ;;  %vm36_vm0 = vcmask 517120   ;;  %v1436_v0 = vmov 0.0   ;;  %v43_v1 = vld [vmem:[#allocation4 + $0x8] sm:$0xff]  ;;  %v45_v2 = vld [vmem:[#allocation4 + $0x18] sm:$0xff]  ;;  %v139_v28 = vlaneseq }
  0x14   :  { %126 = vmatprep.mubr.f32.mxu0 %v1436_v0  ;;  %37 = vst.msk [vmem:[#allocation2] sm:$0x3] %vm36_vm0, %v1436_v0  ;;  %38 = vst.msk [vmem:[#allocation3] sm:$0x3] %vm36_vm0, %v1436_v0  ;;  %253 = vmatprep.mubr.f32.mxu1 %v1436_v0  ;;  %v42_v3 = vld [vmem:[#allocation4] sm:$0xff]  ;;  %v1485_v4 = vpack.c.bf16 %v45_v2, %v43_v1  ;;  %v44_v5 = vld [vmem:[#allocation4 + $0x10] sm:$0xff] }
  0x15   :  { %v47_v6 = vld [vmem:[#allocation4 + $0x28] sm:$0xff]  ;;  %v49_v7 = vld [vmem:[#allocation4 + $0x38] sm:$0xff]  ;;  %v1487_v8 = vpack.c.bf16 %v44_v5, %v42_v3  ;;  %v46_v10 = vld [vmem:[#allocation4 + $0x20] sm:$0xff]  ;;  %vm58_vm1 = vcmask 523264   ;;  %v1437_v26 = vmov 1983009808  }
  0x16   :  { %v1489_v9 = vpack.c.bf16 %v49_v7, %v47_v6  ;;  %v48_v11 = vld [vmem:[#allocation4 + $0x30] sm:$0xff]  ;;  %v51_v12 = vld [vmem:[#allocation4 + $0x48] sm:$0xff]  ;;  %1173 = vmatprep.subr.bf16.mxu0 %v1485_v4  ;;  %v53_v13 = vld [vmem:[#allocation4 + $0x58] sm:$0xff]  ;;  %1189 = vmatprep.subr.bf16.mxu1 %v1485_v4  ;;  %v137_v27 = vunpack.c.l.s4 %v1437_v26  ;;  %v140_v30 = vshrl.u32 %v139_v28, 7  ;;  %s1438_s30 = smov 64   ;;  %vm1440_vm2 = vmmov 0  }
  0x17   :  { %1175 = vmatpush1.bf16.msra.mxu0 %v1487_v8  ;;  %v1494_v14 = vpack.c.bf16 %v48_v11, %v46_v10  ;;  %1191 = vmatpush1.bf16.msra.mxu1 %v1487_v8  ;;  %v1498_v15 = vpack.c.bf16 %v53_v13, %v51_v12  ;;  %v50_v16 = vld [vmem:[#allocation4 + $0x40] sm:$0xff]  ;;  %v52_v17 = vld [vmem:[#allocation4 + $0x50] sm:$0xff]  ;;  %v55_v18 = vld [vmem:[#allocation4 + $0x68] sm:$0xff]  ;;  %s1441_s9 = smov [#allocation7]   ;;  %vm1101_vm3 = vcmask 123904  }
  0x18   :  { %1177 = vmatprep.subr.bf16.mxu0 %v1489_v9  ;;  %1193 = vmatprep.subr.bf16.mxu1 %v1489_v9  ;;  %v57_v19 = vld [vmem:[#allocation4 + $0x78] sm:$0xff]  ;;  %v1502_v20 = vpack.c.bf16 %v52_v17, %v50_v16  ;;  %v54_v22 = vld [vmem:[#allocation4 + $0x60] sm:$0xff]  ;;  %v56_v23 = vld [vmem:[#allocation4 + $0x70] sm:$0xff]  ;;  %v138_v29 = vunpack.c.0.s8 %v137_v27  ;;  %s1109_s10 = sshll.u32 %s1441_s9, 4  ;;  %s1110_s10 = int_to_ptr.vmem [resolvable:$true] %s1109_s10 }
  0x19   :  { %v1506_v21 = vpack.c.bf16 %v57_v19, %v55_v18  ;;  %v1510_v24 = vpack.c.bf16 %v56_v23, %v54_v22  ;;  %v41_v35 = vld [vmem:[%s1683_s0] sm:$0xf]  ;;  %v1121_v58 = vld [vmem:[%s1683_s0 + $0x4] sm:$0xf]  ;;  %v1124_v23 = vld [vmem:[%s1683_s0 + $0x8] sm:$0xf]  ;;  %p1412_p9 = scmp.lt.s32.totalorder %s1110_s10, %s1110_s10 }
  0x1a   :  { %v1529_v32 = vsub.s32 %v138_v29, %v140_v30 }
  0x1b   :  { %1179 = vmatpush1.bf16.msra.mxu0 %v1494_v14  ;;  %1195 = vmatpush1.bf16.msra.mxu1 %v1494_v14  ;;  %v39_v25 = vld [vmem:[#allocation2] sm:$0x3]  ;;  %v1120_v38 = vld.sshfl [vmem:[#allocation3] sm:$0x3 pattern:$0x76325410] }
  0x1c   :  { %1181 = vmatprep.subr.bf16.mxu0 %v1498_v15  ;;  %1197 = vmatprep.subr.bf16.mxu1 %v1498_v15 }
  0x1f   :  { %1183 = vmatpush1.bf16.msra.mxu0 %v1502_v20  ;;  %1199 = vmatpush1.bf16.msra.mxu1 %v1502_v20 }
  0x20   :  { %1185 = vmatprep.subr.bf16.mxu0 %v1506_v21  ;;  %1201 = vmatprep.subr.bf16.mxu1 %v1506_v21 }
  0x23   :  { %1187 = vmatpush1.bf16.msra.mxu0 %v1510_v24  ;;  %1203 = vmatpush1.bf16.msra.mxu1 %v1510_v24 }
  0x24   :  { %1205 = vmatprep.subr.bf16.mxu0 %v1485_v4  ;;  %1221 = vmatprep.subr.bf16.mxu1 %v1485_v4 }
  0x26   :  { %1118 = vmatmul.mubr.msk.f32.vlgmr.msra.gmra.mrb[0].mxu0 %vm58_vm1, %v39_v25 }
  0x27   :  { %1207 = vmatpush1.bf16.msra.mxu0 %v1487_v8  ;;  %369 = vmatprep.mubr.f32.mxu0 %v1436_v0 }
  0x28   :  { %1209 = vmatprep.subr.bf16.mxu0 %v1489_v9 }
  0x2b   :  { %1211 = vmatpush1.bf16.msra.mxu0 %v1494_v14 }
  0x2c   :  { %1213 = vmatprep.subr.bf16.mxu0 %v1498_v15 }
  0x2f   :  { %1215 = vmatpush1.bf16.msra.mxu0 %v1502_v20 }
  0x30   :  { %1217 = vmatprep.subr.bf16.mxu0 %v1506_v21 }
  0x33   :  { %1219 = vmatpush1.bf16.msra.mxu0 %v1510_v24 }
  0x34   :  { %1237 = vmatprep.subr.bf16.mxu0 %v1485_v4 }
  0xf9   :  { %v128_v31 = vpop.f32.mrb[0].mxu0 }
  0xfa   :  { %v130_v33 = vpop.f32.mrb[1].mxu0 }
  0xfb   :  { %v135_v34 = vcombine.low %v128_v31, %v130_v33 }
  0xfd   :  { %v142_v36 = vrot.slane %v135_v34, %v1529_v32 }
  0xff   :  { %v144_v37 = vadd.f32 %v142_v36, %v41_v35 }
 0x101   :  { %152 = vrot.lane.b32.xlu0 %v144_v37, %s1438_s30  ;;  %v1119_v39 = vmul.f32 -1.442695, %v144_v37 }
 0x103   :  { %1321 = vpow2.f32 %v1119_v39 }
 0x105   :  { %165 = vrot.lane.b32.xlu0 %v1120_v38, %s1438_s30 }
 0x10d   :  { %v1322_v40 = vpop.eup %1321 }
 0x10e   :  { %v148_v41 = vadd.f32 1.0, %v1322_v40 }
 0x110   :  { %1323 = vrcp.f32 %v148_v41 }
 0x11a   :  { %v1324_v44 = vpop.eup %1323 }
 0x11b   :  { %v177_v52 = vrot.slane %v1324_v44, 2 }
 0x173   :  { %v153_v42 = vpop.permute.xlu0 %152 }
 0x174   :  { %v154_v43 = vrot.slane %v153_v42, 2 }
 0x176   :  { %1325 = vtanh.f32 %v154_v43 }
 0x177   :  { %v166_v47 = vpop.permute.xlu0 %165 }
 0x178   :  { %v168_v48 = vmul.f32 %v1324_v44, %v166_v47 }
 0x180   :  { %v1326_v45 = vpop.eup %1325 }
 0x181   :  { %v169_v46 = vmul.f32 %v1326_v45, %v1324_v44 }
 0x183   :  { %171 = vrot.lane.b32.xlu1 %v169_v46, %s1438_s30  ;;  %v1127_v46 = vld [vmem:[%s1683_s0 + $0xc] sm:$0xf] }
 0x1f5   :  { %v172_v49 = vpop.permute.xlu1 %171 }
 0x1f6   :  { %v174_v50 = vadd.f32 %v172_v49, %v168_v48 }
 0x1f8   :  { %1327 = vtanh.f32 %v174_v50 }
 0x202   :  { %v1328_v51 = vpop.eup %1327 }
 0x203   :  { %180 = vrot.lane.b32.xlu1 %v1328_v51, %s1438_s30 }
 0x275   :  { %v181_v53 = vpop.permute.xlu1 %180 }
 0x276   :  { %v183_v54 = vmul.f32 %v181_v53, %v177_v52 }
 0x278   :  { %1122 = vmatmul.mubr.msk.f32.vlgmr.msra.gmra.mrb[0].mxu1 %vm58_vm1, %v183_v54 }
 0x279   :  { %1223 = vmatpush1.bf16.msra.mxu1 %v1487_v8  ;;  %485 = vmatprep.mubr.f32.mxu1 %v1436_v0 }
 0x27a   :  { %1225 = vmatprep.subr.bf16.mxu1 %v1489_v9 }
 0x27d   :  { %1227 = vmatpush1.bf16.msra.mxu1 %v1494_v14 }
 0x27e   :  { %1229 = vmatprep.subr.bf16.mxu1 %v1498_v15 }
 0x281   :  { %1231 = vmatpush1.bf16.msra.mxu1 %v1502_v20 }
 0x282   :  { %1233 = vmatprep.subr.bf16.mxu1 %v1506_v21 }
 0x285   :  { %1235 = vmatpush1.bf16.msra.mxu1 %v1510_v24 }
 0x286   :  { %1253 = vmatprep.subr.bf16.mxu1 %v1485_v4 }
 0x34b   :  { %v255_v55 = vpop.f32.mrb[0].mxu1 }
 0x34c   :  { %v257_v56 = vpop.f32.mrb[1].mxu1 }
 0x34d   :  { %v262_v57 = vcombine.low %v255_v55, %v257_v56 }
 0x34f   :  { %v269_v59 = vrot.slane %v262_v57, %v1529_v32 }
 0x351   :  { %v271_v60 = vadd.f32 %v1121_v58, %v269_v59 }
 0x353   :  { %279 = vrot.lane.b32.xlu0 %v271_v60, %s1438_s30  ;;  %v1123_v61 = vmul.f32 -1.442695, %v271_v60 }
 0x355   :  { %1329 = vpow2.f32 %v1123_v61 }
 0x35f   :  { %v1330_v62 = vpop.eup %1329 }
 0x360   :  { %v275_v63 = vadd.f32 1.0, %v1330_v62 }
 0x362   :  { %1331 = vrcp.f32 %v275_v63 }
 0x36c   :  { %v1332_v3 = vpop.eup %1331 }
 0x36d   :  { %v284_v7 = vmul.f32 %v1332_v3, %v174_v50  ;;  %v293_v13 = vrot.slane %v1332_v3, 2 }
 0x3c5   :  { %v280_v1 = vpop.permute.xlu0 %279 }
 0x3c6   :  { %v281_v2 = vrot.slane %v280_v1, 2 }
 0x3c8   :  { %1333 = vtanh.f32 %v281_v2 }
 0x3d2   :  { %v1334_v5 = vpop.eup %1333 }
 0x3d3   :  { %v285_v6 = vmul.f32 %v1334_v5, %v1332_v3  ;;  %v1130_v3 = vld [vmem:[%s1683_s0 + $0x10] sm:$0xf] }
 0x3d5   :  { %287 = vrot.lane.b32.xlu1 %v285_v6, %s1438_s30 }
 0x447   :  { %v288_v10 = vpop.permute.xlu1 %287 }
 0x448   :  { %v290_v11 = vadd.f32 %v288_v10, %v284_v7 }
 0x44a   :  { %1335 = vtanh.f32 %v290_v11 }
 0x454   :  { %v1336_v12 = vpop.eup %1335 }
 0x455   :  { %296 = vrot.lane.b32.xlu0 %v1336_v12, %s1438_s30 }
 0x4c7   :  { %v297_v16 = vpop.permute.xlu0 %296 }
 0x4c8   :  { %v299_v17 = vmul.f32 %v297_v16, %v293_v13 }
 0x4ca   :  { %1125 = vmatmul.mubr.msk.f32.vlgmr.msra.gmra.mrb[2].mxu0 %vm58_vm1, %v299_v17 }
 0x4cb   :  { %1239 = vmatpush1.bf16.msra.mxu0 %v1487_v8  ;;  %601 = vmatprep.mubr.f32.mxu0 %v1436_v0 }
 0x4cc   :  { %1241 = vmatprep.subr.bf16.mxu0 %v1489_v9 }
 0x4cf   :  { %1243 = vmatpush1.bf16.msra.mxu0 %v1494_v14 }
 0x4d0   :  { %1245 = vmatprep.subr.bf16.mxu0 %v1498_v15 }
 0x4d3   :  { %1247 = vmatpush1.bf16.msra.mxu0 %v1502_v20 }
 0x4d4   :  { %1249 = vmatprep.subr.bf16.mxu0 %v1506_v21 }
 0x4d7   :  { %1251 = vmatpush1.bf16.msra.mxu0 %v1510_v24 }
 0x4d8   :  { %1269 = vmatprep.subr.bf16.mxu0 %v1485_v4 }
 0x59d   :  { %v371_v18 = vpop.f32.mrb[2].mxu0 }
 0x59e   :  { %v373_v19 = vpop.f32.mrb[3].mxu0 }
 0x59f   :  { %v378_v22 = vcombine.low %v371_v18, %v373_v19 }
 0x5a1   :  { %v385_v25 = vrot.slane %v378_v22, %v1529_v32 }
 0x5a3   :  { %v387_v26 = vadd.f32 %v1124_v23, %v385_v25 }
 0x5a5   :  { %395 = vrot.lane.b32.xlu1 %v387_v26, %s1438_s30  ;;  %v1126_v27 = vmul.f32 -1.442695, %v387_v26 }
 0x5a7   :  { %1337 = vpow2.f32 %v1126_v27 }
 0x5b1   :  { %v1338_v28 = vpop.eup %1337 }
 0x5b2   :  { %v391_v29 = vadd.f32 1.0, %v1338_v28 }
 0x5b4   :  { %1339 = vrcp.f32 %v391_v29 }
 0x5be   :  { %v1340_v33 = vpop.eup %1339 }
 0x5bf   :  { %v400_v36 = vmul.f32 %v1340_v33, %v290_v11  ;;  %v409_v40 = vrot.slane %v1340_v33, 2 }
 0x617   :  { %v396_v30 = vpop.permute.xlu1 %395 }
 0x618   :  { %v397_v31 = vrot.slane %v396_v30, 2 }
 0x61a   :  { %1341 = vtanh.f32 %v397_v31 }
 0x624   :  { %v1342_v34 = vpop.eup %1341 }
 0x625   :  { %v401_v35 = vmul.f32 %v1342_v34, %v1340_v33 }
 0x627   :  { %403 = vrot.lane.b32.xlu0 %v401_v35, %s1438_s30 }
 0x699   :  { %v404_v37 = vpop.permute.xlu0 %403 }
 0x69a   :  { %v406_v38 = vadd.f32 %v404_v37, %v400_v36 }
 0x69c   :  { %1343 = vtanh.f32 %v406_v38 }
 0x6a6   :  { %v1344_v39 = vpop.eup %1343 }
 0x6a7   :  { %412 = vrot.lane.b32.xlu1 %v1344_v39, %s1438_s30 }
 0x719   :  { %v413_v41 = vpop.permute.xlu1 %412 }
 0x71a   :  { %v415_v42 = vmul.f32 %v413_v41, %v409_v40 }
 0x71c   :  { %1128 = vmatmul.mubr.msk.f32.vlgmr.msra.gmra.mrb[2].mxu1 %vm58_vm1, %v415_v42 }
 0x71d   :  { %1255 = vmatpush1.bf16.msra.mxu1 %v1487_v8  ;;  %717 = vmatprep.mubr.f32.mxu1 %v1436_v0 }
 0x71e   :  { %1257 = vmatprep.subr.bf16.mxu1 %v1489_v9 }
 0x721   :  { %1259 = vmatpush1.bf16.msra.mxu1 %v1494_v14 }
 0x722   :  { %1261 = vmatprep.subr.bf16.mxu1 %v1498_v15 }
 0x725   :  { %1263 = vmatpush1.bf16.msra.mxu1 %v1502_v20 }
 0x726   :  { %1265 = vmatprep.subr.bf16.mxu1 %v1506_v21 }
 0x729   :  { %1267 = vmatpush1.bf16.msra.mxu1 %v1510_v24 }
 0x72a   :  { %1285 = vmatprep.subr.bf16.mxu1 %v1485_v4 }
 0x7ef   :  { %v487_v43 = vpop.f32.mrb[2].mxu1 }
 0x7f0   :  { %v489_v44 = vpop.f32.mrb[3].mxu1 }
 0x7f1   :  { %v494_v45 = vcombine.low %v487_v43, %v489_v44 }
 0x7f3   :  { %v501_v47 = vrot.slane %v494_v45, %v1529_v32 }
 0x7f5   :  { %v503_v48 = vadd.f32 %v1127_v46, %v501_v47  ;;  %v1136_v47 = vld [vmem:[%s1683_s0 + $0x18] sm:$0xf] }
 0x7f7   :  { %511 = vrot.lane.b32.xlu0 %v503_v48, %s1438_s30  ;;  %v1129_v49 = vmul.f32 -1.442695, %v503_v48 }
 0x7f9   :  { %1345 = vpow2.f32 %v1129_v49 }
 0x803   :  { %v1346_v50 = vpop.eup %1345 }
 0x804   :  { %v507_v51 = vadd.f32 1.0, %v1346_v50 }
 0x806   :  { %1347 = vrcp.f32 %v507_v51 }
 0x810   :  { %v1348_v4 = vpop.eup %1347 }
 0x811   :  { %v516_v56 = vmul.f32 %v1348_v4, %v406_v38  ;;  %v525_v60 = vrot.slane %v1348_v4, 2 }
 0x869   :  { %v512_v52 = vpop.permute.xlu0 %511 }
 0x86a   :  { %v513_v53 = vrot.slane %v512_v52, 2 }
 0x86c   :  { %1349 = vtanh.f32 %v513_v53 }
 0x876   :  { %v1350_v54 = vpop.eup %1349 }
 0x877   :  { %v517_v55 = vmul.f32 %v1350_v54, %v1348_v4 }
 0x879   :  { %519 = vrot.lane.b32.xlu1 %v517_v55, %s1438_s30 }
 0x8eb   :  { %v520_v57 = vpop.permute.xlu1 %519 }
 0x8ec   :  { %v522_v58 = vadd.f32 %v520_v57, %v516_v56 }
 0x8ee   :  { %1351 = vtanh.f32 %v522_v58 }
 0x8f8   :  { %v1352_v59 = vpop.eup %1351 }
 0x8f9   :  { %528 = vrot.lane.b32.xlu0 %v1352_v59, %s1438_s30 }
 0x96b   :  { %v529_v61 = vpop.permute.xlu0 %528 }
 0x96c   :  { %v531_v62 = vmul.f32 %v529_v61, %v525_v60 }
 0x96e   :  { %1131 = vmatmul.mubr.msk.f32.vlgmr.msra.gmra.mrb[4].mxu0 %vm58_vm1, %v531_v62 }
 0x96f   :  { %1271 = vmatpush1.bf16.msra.mxu0 %v1487_v8  ;;  %833 = vmatprep.mubr.f32.mxu0 %v1436_v0 }
 0x970   :  { %1273 = vmatprep.subr.bf16.mxu0 %v1489_v9 }
 0x973   :  { %1275 = vmatpush1.bf16.msra.mxu0 %v1494_v14 }
 0x974   :  { %1277 = vmatprep.subr.bf16.mxu0 %v1498_v15 }
 0x977   :  { %1279 = vmatpush1.bf16.msra.mxu0 %v1502_v20 }
 0x978   :  { %1281 = vmatprep.subr.bf16.mxu0 %v1506_v21 }
 0x97b   :  { %1283 = vmatpush1.bf16.msra.mxu0 %v1510_v24 }
 0xa41   :  { %v603_v63 = vpop.f32.mrb[4].mxu0 }
 0xa42   :  { %v605_v1 = vpop.f32.mrb[5].mxu0 }
 0xa43   :  { %v610_v2 = vcombine.low %v603_v63, %v605_v1 }
 0xa45   :  { %v617_v5 = vrot.slane %v610_v2, %v1529_v32 }
 0xa47   :  { %v619_v6 = vadd.f32 %v1130_v3, %v617_v5  ;;  %v1139_v5 = vld [vmem:[%s1683_s0 + $0x1c] sm:$0xf] }
 0xa49   :  { %627 = vrot.lane.b32.xlu1 %v619_v6, %s1438_s30  ;;  %v1132_v7 = vmul.f32 -1.442695, %v619_v6 }
 0xa4b   :  { %1353 = vpow2.f32 %v1132_v7 }
 0xa55   :  { %v1354_v10 = vpop.eup %1353 }
 0xa56   :  { %v623_v11 = vadd.f32 1.0, %v1354_v10 }
 0xa58   :  { %1355 = vrcp.f32 %v623_v11 }
 0xa62   :  { %v1356_v16 = vpop.eup %1355 }
 0xa63   :  { %v632_v19 = vmul.f32 %v1356_v16, %v522_v58  ;;  %v641_v26 = vrot.slane %v1356_v16, 2 }
 0xabb   :  { %v628_v12 = vpop.permute.xlu1 %627 }
 0xabc   :  { %v629_v13 = vrot.slane %v628_v12, 2 }
 0xabe   :  { %1357 = vtanh.f32 %v629_v13 }
 0xac8   :  { %v1358_v17 = vpop.eup %1357 }
 0xac9   :  { %v633_v18 = vmul.f32 %v1358_v17, %v1356_v16 }
 0xacb   :  { %635 = vrot.lane.b32.xlu0 %v633_v18, %s1438_s30 }
 0xb3d   :  { %v636_v22 = vpop.permute.xlu0 %635 }
 0xb3e   :  { %v638_v23 = vadd.f32 %v636_v22, %v632_v19  ;;  %v1013_v22 = vld [vmem:[%s1685_s2] sm:$0xff] }
 0xb40   :  { %1359 = vtanh.f32 %v638_v23 }
 0xb4a   :  { %v1360_v25 = vpop.eup %1359 }
 0xb4b   :  { %644 = vrot.lane.b32.xlu1 %v1360_v25, %s1438_s30  ;;  %v1439_v25 = vmov 0.0|0.0  }
 0xb4c   :  { %1300 = vmatprep.subr.bf16.mxu0 %v1439_v25 }
 0xbbd   :  { %v645_v27 = vpop.permute.xlu1 %644 }
 0xbbe   :  { %v647_v28 = vmul.f32 %v645_v27, %v641_v26  ;;  %v1015_v27 = vld [vmem:[%s1685_s2 + $0x10] sm:$0xff] }
 0xbc0   :  { %1134 = vmatmul.mubr.msk.f32.vlgmr.msra.gmra.mrb[4].mxu1 %vm58_vm1, %v647_v28  ;;  %v1016_v28 = vld [vmem:[%s1685_s2 + $0x18] sm:$0xff] }
 0xbc1   :  { %1287 = vmatpush1.bf16.msra.mxu1 %v1487_v8  ;;  %949 = vmatprep.mubr.f32.mxu1 %v1436_v0  ;;  %v1133_v8 = vld [vmem:[%s1683_s0 + $0x14] sm:$0xf] }
 0xbc2   :  { %1289 = vmatprep.subr.bf16.mxu1 %v1489_v9 }
 0xbc5   :  { %1291 = vmatpush1.bf16.msra.mxu1 %v1494_v14 }
 0xbc6   :  { %1293 = vmatprep.subr.bf16.mxu1 %v1498_v15 }
 0xbc9   :  { %1295 = vmatpush1.bf16.msra.mxu1 %v1502_v20 }
 0xbca   :  { %1297 = vmatprep.subr.bf16.mxu1 %v1506_v21 }
 0xbcd   :  { %1299 = vmatpush1.bf16.msra.mxu1 %v1510_v24 }
 0xc93   :  { %v719_v29 = vpop.f32.mrb[4].mxu1 }
 0xc94   :  { %v721_v30 = vpop.f32.mrb[5].mxu1 }
 0xc95   :  { %v726_v31 = vcombine.low %v719_v29, %v721_v30  ;;  %v1304_v29 = vpack.c.bf16 %v1016_v28, %v1015_v27  ;;  %v1017_v30 = vld [vmem:[%s1685_s2 + $0x20] sm:$0xff] }
 0xc97   :  { %v733_v33 = vrot.slane %v726_v31, %v1529_v32  ;;  %v1018_v31 = vld [vmem:[%s1685_s2 + $0x28] sm:$0xff] }
 0xc99   :  { %v735_v9 = vadd.f32 %v1133_v8, %v733_v33  ;;  %v1307_v8 = vpack.c.bf16 %v1018_v31, %v1017_v30  ;;  %v1019_v33 = vld [vmem:[%s1685_s2 + $0x30] sm:$0xff] }
 0xc9b   :  { %743 = vrot.lane.b32.xlu0 %v735_v9, %s1438_s30  ;;  %v1135_v14 = vmul.f32 -1.442695, %v735_v9  ;;  %v1020_v9 = vld [vmem:[%s1685_s2 + $0x38] sm:$0xff] }
 0xc9d   :  { %1361 = vpow2.f32 %v1135_v14  ;;  %v1310_v14 = vpack.c.bf16 %v1020_v9, %v1019_v33 }
 0xca7   :  { %v1362_v15 = vpop.eup %1361 }
 0xca8   :  { %v739_v20 = vadd.f32 1.0, %v1362_v15 }
 0xcaa   :  { %1363 = vrcp.f32 %v739_v20 }
 0xcb4   :  { %v1364_v24 = vpop.eup %1363 }
 0xcb5   :  { %v748_v37 = vmul.f32 %v1364_v24, %v638_v23  ;;  %v757_v41 = vrot.slane %v1364_v24, 2  ;;  %v1014_v23 = vld [vmem:[%s1685_s2 + $0x8] sm:$0xff] }
 0xcb6   :  { %v1301_v26 = vpack.c.bf16 %v1014_v23, %v1013_v22 }
 0xd0d   :  { %v744_v34 = vpop.permute.xlu0 %743 }
 0xd0e   :  { %v745_v21 = vrot.slane %v744_v34, 2 }
 0xd10   :  { %1365 = vtanh.f32 %v745_v21 }
 0xd1a   :  { %v1366_v35 = vpop.eup %1365 }
 0xd1b   :  { %v749_v36 = vmul.f32 %v1366_v35, %v1364_v24 }
 0xd1d   :  { %751 = vrot.lane.b32.xlu1 %v749_v36, %s1438_s30 }
 0xd8f   :  { %v752_v38 = vpop.permute.xlu1 %751 }
 0xd90   :  { %v754_v39 = vadd.f32 %v752_v38, %v748_v37 }
 0xd92   :  { %1367 = vtanh.f32 %v754_v39 }
 0xd9c   :  { %v1368_v40 = vpop.eup %1367 }
 0xd9d   :  { %760 = vrot.lane.b32.xlu0 %v1368_v40, %s1438_s30 }
 0xe0f   :  { %v761_v42 = vpop.permute.xlu0 %760 }
 0xe10   :  { %v763_v43 = vmul.f32 %v761_v42, %v757_v41 }
 0xe12   :  { %1137 = vmatmul.mubr.msk.f32.vlgmr.msra.gmra.mrb[6].mxu0 %vm58_vm1, %v763_v43 }
 0xe13   :  { %1302 = vmatpush3.bf16.msra.mxu0 %v1301_v26  ;;  %1169 = vmatprep.mubr.msk.f32.mxu0 %vm1440_vm2, %v1436_v0  ;;  %v1142_v0 = vld [vmem:[%s1686_s3] ss:$0 sm:$0xff] }
 0xe14   :  { %1303 = vmatprep.subr.bf16.mxu0 %v1439_v25 }
 0xe17   :  { %1305 = vmatpush3.bf16.msra.mxu0 %v1304_v29 }
 0xe18   :  { %1306 = vmatprep.subr.bf16.mxu0 %v1439_v25 }
 0xe1b   :  { %1308 = vmatpush3.bf16.msra.mxu0 %v1307_v8 }
 0xe1c   :  { %1309 = vmatprep.subr.bf16.mxu0 %v1439_v25 }
 0xe1f   :  { %1311 = vmatpush3.bf16.msra.mxu0 %v1310_v14 }
 0xee5   :  { %v835_v44 = vpop.f32.mrb[6].mxu0 }
 0xee6   :  { %v837_v45 = vpop.f32.mrb[7].mxu0 }
 0xee7   :  { %v842_v46 = vcombine.low %v835_v44, %v837_v45 }
 0xee9   :  { %v849_v48 = vrot.slane %v842_v46, %v1529_v32 }
 0xeeb   :  { %v851_v49 = vadd.f32 %v1136_v47, %v849_v48 }
 0xeed   :  { %859 = vrot.lane.b32.xlu1 %v851_v49, %s1438_s30  ;;  %v1138_v50 = vmul.f32 -1.442695, %v851_v49 }
 0xeef   :  { %1369 = vpow2.f32 %v1138_v50 }
 0xef9   :  { %v1370_v51 = vpop.eup %1369 }
 0xefa   :  { %v855_v52 = vadd.f32 1.0, %v1370_v51 }
 0xefc   :  { %1371 = vrcp.f32 %v855_v52 }
 0xf06   :  { %v1372_v54 = vpop.eup %1371 }
 0xf07   :  { %v864_v57 = vmul.f32 %v1372_v54, %v754_v39  ;;  %v873_v61 = vrot.slane %v1372_v54, 2 }
 0xf5f   :  { %v860_v53 = vpop.permute.xlu1 %859 }
 0xf60   :  { %v861_v4 = vrot.slane %v860_v53, 2 }
 0xf62   :  { %1373 = vtanh.f32 %v861_v4 }
 0xf6c   :  { %v1374_v55 = vpop.eup %1373 }
 0xf6d   :  { %v865_v56 = vmul.f32 %v1374_v55, %v1372_v54 }
 0xf6f   :  { %867 = vrot.lane.b32.xlu0 %v865_v56, %s1438_s30 }
 0xfe1   :  { %v868_v58 = vpop.permute.xlu0 %867 }
 0xfe2   :  { %v870_v59 = vadd.f32 %v868_v58, %v864_v57 }
 0xfe4   :  { %1375 = vtanh.f32 %v870_v59 }
 0xfee   :  { %v1376_v60 = vpop.eup %1375 }
 0xfef   :  { %876 = vrot.lane.b32.xlu1 %v1376_v60, %s1438_s30 }
0x1061   :  { %v877_v62 = vpop.permute.xlu1 %876 }
0x1062   :  { %v879_v63 = vmul.f32 %v877_v62, %v873_v61 }
0x1064   :  { %1140 = vmatmul.mubr.msk.f32.vlgmr.msra.gmra.mrb[6].mxu1 %vm58_vm1, %v879_v63 }
0x1137   :  { %v951_v1 = vpop.f32.mrb[6].mxu1 }
0x1138   :  { %v953_v2 = vpop.f32.mrb[7].mxu1 }
0x1139   :  { %v958_v3 = vcombine.low %v951_v1, %v953_v2 }
0x113b   :  { %v965_v6 = vrot.slane %v958_v3, %v1529_v32 }
0x113d   :  { %v967_v7 = vadd.f32 %v1139_v5, %v965_v6 }
0x113f   :  { %975 = vrot.lane.b32.xlu0 %v967_v7, %s1438_s30  ;;  %v1141_v10 = vmul.f32 -1.442695, %v967_v7 }
0x1141   :  { %1377 = vpow2.f32 %v1141_v10 }
0x114b   :  { %v1378_v11 = vpop.eup %1377 }
0x114c   :  { %v971_v12 = vadd.f32 1.0, %v1378_v11 }
0x114e   :  { %1379 = vrcp.f32 %v971_v12 }
0x1158   :  { %v1380_v17 = vpop.eup %1379 }
0x1159   :  { %v980_v15 = vmul.f32 %v1380_v17, %v870_v59  ;;  %v989_v36 = vrot.slane %v1380_v17, 2 }
0x11b1   :  { %v976_v13 = vpop.permute.xlu0 %975 }
0x11b2   :  { %v977_v16 = vrot.slane %v976_v13, 2 }
0x11b4   :  { %1381 = vtanh.f32 %v977_v16 }
0x11be   :  { %v1382_v18 = vpop.eup %1381 }
0x11bf   :  { %v981_v19 = vmul.f32 %v1382_v18, %v1380_v17 }
0x11c1   :  { %983 = vrot.lane.b32.xlu1 %v981_v19, %s1438_s30 }
0x1233   :  { %v984_v20 = vpop.permute.xlu1 %983 }
0x1234   :  { %v986_v34 = vadd.f32 %v984_v20, %v980_v15 }
0x1236   :  { %1383 = vtanh.f32 %v986_v34  ;;  %v1005_v21 = vrot.slane %v986_v34, %v1529_v32 }
0x1238   :  { %1006 = vrot.lane.b32.xlu1 %v1005_v21, %s1438_s30 }
0x1240   :  { %v1384_v24 = vpop.eup %1383 }
0x1241   :  { %992 = vrot.lane.b32.xlu0 %v1384_v24, %s1438_s30  ;;  %s1407_s30 = scalar_lea.vmem %s1110_s10, 32 }
0x1242   :  { %p1408_p8 = scmp.ne.s32.totalorder %s1110_s10, %s1407_s30  ;;  %p1413_p10 = scmp.lt.s32.totalorder %s1407_s30, %s1407_s30 }
0x1244   :  { %p1414_p11 = por %p1413_p10, %p1412_p9 }
0x1246   :  { %p1415_p12 = pnand %p1414_p11, %p1408_p8 }
0x12aa   :  { %v1007_v35 = vpop.permute.xlu1 %1006 }
0x12ab   :  { %1009 = vst.msk [vmem:[#allocation3] sm:$0x3] %vm36_vm0, %v1007_v35 }
0x12b3   :  { %v993_v37 = vpop.permute.xlu0 %992 }
0x12b4   :  { %v995_v38 = vmul.f32 %v993_v37, %v989_v36 }
0x12b6   :  { %997 = vst.msk [vmem:[#allocation2] sm:$0x3] %vm36_vm0, %v995_v38  ;;  %1170 = vmatmul.mubr.msk.f32.vlgmr.msra.gmra.mrb[8].mxu0 %vm58_vm1, %v995_v38 }
0x1389   :  { %v1097_v32 = vpop.f32.mrb[8].mxu0 }
0x138a   :  { %v1098_v39 = vadd.f32 %v1142_v0, %v1097_v32  ;;  %v1171_v40 = vpop.f32.mrb[9].mxu0 }
0x138c   :  { %1102 = vst.msk [vmem:[#allocation7] sm:$0x3] %vm1101_vm3, %v1098_v39 }
0x138d   :  { %1418 = shalt.err (!%p1415_p12)
}
0x138e   :  { %s1419_s13 = scalar_lea.hbm %s1687_s4, 32 }
0x138f   :  { %p1420_p13 = scmp.ne.s32.totalorder %s1687_s4, %s1419_s13  ;;  %p1423_p0 = scmp.lt.u32.totalorder %s1419_s13, %s1687_s4 }
0x1391   :  { %p1425_p1 = pnand %p1423_p0, %p1420_p13 }
0x1393   :  { %1428 = shalt.err (!%p1425_p1)
}
0x1394   :  { %1112 = dma.vmem_to_hbm [thread:$0]  %s1110_s10, 32, %s1687_s4, [#allocation6]  }
0x1395   :  { %1431 = dma.done.wait [#allocation6], 32  }
0x1396   :  { %1432 = vsyncadd [#allocation6], 4294967264 }
0x1397   :  { %1116 = vsyncpa [#allocation5], 1 }
0x1398   :  { %1117 = vsyncpa [#allocation6], 1 }

</bundles_post_ra>
